<compile_context>
chip_gen: v6e
topology: v6e:2x2x1
jax: 0.10.0
libtpu: 0.0.40
codegen_flags: <defaults>
</compile_context>

<pallas_src>
import jax
import jax.numpy as jnp
from jax import lax
from jax.experimental import pallas as pl
from jax.experimental.pallas import tpu as pltpu


def _make_parallel_kernel(shifts, l_out):
    """`shifts`: flat-index offset of each 3x3 tap in the row-major padded image."""

    def kernel(x_ref, w_ref, b_ref, o_ref, acc_ref):
        # x_ref  : (1, Cin, L_in)   compute dtype (bf16); zero-padded image, spatial on lanes
        # w_ref  : (9, TC, Cin)     compute dtype; per-tap fused weights (1x1 in center tap)
        # b_ref  : (TC, 1)          f32 fused bias (kept f32: added to the f32 accumulator)
        # o_ref  : (1, TC, L_out)   "wide" conv output, L_out = H * (W + 2), lane-dense
        # acc_ref: (TC, L_out)      f32 VMEM accumulator
        #
        # Scratch-free conv: every tap is a contiguous static lane-slice of the flat
        # padded image, read straight off the Ref as the matmul RHS (no im2col patch
        # matrix, no full-tile value materialization).
        s0 = shifts[0]
        acc_ref[...] = b_ref[...] + jnp.dot(
            w_ref[0], x_ref[0, :, s0:s0 + l_out],
            preferred_element_type=jnp.float32)
        for t in range(1, 9):
            s = shifts[t]
            # TODO(synk): tap offsets (1, 2, wp, ...) are not 128-aligned, so each RHS
            # load pays a cross-lane relayout; if the bundle dump at production Cout
            # shows XLU/vld binding before the MXU, restructure to 3 base-shifted
            # copies + 3 K=3*Cin matmuls.
            acc_ref[...] += jnp.dot(
                w_ref[t], x_ref[0, :, s:s + l_out],
                preferred_element_type=jnp.float32)
        o_ref[...] = acc_ref[...][None].astype(o_ref.dtype)

    return kernel


def parallel_forward(x_nchw, w3, b3, w1, b1, *,
                     compute_dtype=jnp.bfloat16, cout_tile=None):
    """forward(x) = conv3x3(x, padding=1) + conv1x1(x)  (imagen `Parallel`).

    x_nchw: (N, Cin, H, W).  w3: (3, 3, Cin, Cout) HWIO.  w1: (Cin, Cout).
    Returns (N, Cout, H, W) in x's dtype.
    """
    N, Cin, H, W = x_nchw.shape
    Cout = w3.shape[-1]
    wp = W + 2                       # padded width
    l_out = H * wp                   # "wide" output length per image (lane axis)
    l_in = (H + 3) * wp              # H padded by (1,2): max tap shift 2*wp+2 stays in bounds

    # ---- host-side algebraic fold: conv1x1 == 3x3 conv with only the center tap ----
    w_fold = w3.astype(jnp.float32).at[1, 1].add(w1.astype(jnp.float32))   # (3,3,Cin,Cout)
    b_fold = (b3.astype(jnp.float32) + b1.astype(jnp.float32)).reshape(Cout, 1)  # f32
    # Per-tap (Cout, Cin) matrices; tap index t = ky*3 + kx matches `shifts` below.
    w_taps = jnp.transpose(w_fold.reshape(9, Cin, Cout), (0, 2, 1)).astype(compute_dtype)

    # Single fused pad + flatten + cast (one XLA pass; no NCHW<->NHWC transposes).
    x_flat = jnp.pad(x_nchw, ((0, 0), (0, 0), (1, 2), (1, 1))
                     ).reshape(N, Cin, l_in).astype(compute_dtype)

    # Cout tiling: bounds the per-step f32 accumulator and gives a second parallel
    # grid axis so both v7x TensorCores stay busy even at N=1.
    if cout_tile is None:
        cout_tile = 128 if (Cout > 128 and Cout % 128 == 0) else Cout
    if Cout % cout_tile != 0:
        cout_tile = Cout
    n_ct = Cout // cout_tile

    shifts = tuple(ky * wp + kx for ky in range(3) for kx in range(3))
    kernel = _make_parallel_kernel(shifts, l_out)

    # Explicit VMEM budget: double-buffered I/O blocks + accumulator scratch + headroom.
    csize = jnp.dtype(compute_dtype).itemsize
    osize = jnp.dtype(x_nchw.dtype).itemsize
    block_bytes = (Cin * l_in * csize                 # input image block
                   + 9 * cout_tile * Cin * csize      # weight block
                   + cout_tile * 4                    # bias block
                   + cout_tile * l_out * osize)       # output block
    vmem_needed = 2 * block_bytes + cout_tile * l_out * 4 + (1 << 20)
    vmem_limit = int(min(max(2 * vmem_needed, 32 * 1024 * 1024), 64 * 1024 * 1024))

    out_wide = pl.pallas_call(
        kernel,
        out_shape=jax.ShapeDtypeStruct((N, Cout, l_out), x_nchw.dtype),
        grid_spec=pltpu.PrefetchScalarGridSpec(
            num_scalar_prefetch=0,
            grid=(N, n_ct),
            in_specs=[
                # Full padded image per n; block index constant across the inner Cout
                # axis, so it is not re-DMAed between c steps.
                pl.BlockSpec((1, Cin, l_in), lambda n, c: (n, 0, 0)),
                pl.BlockSpec((9, cout_tile, Cin), lambda n, c: (0, c, 0)),
                pl.BlockSpec((cout_tile, 1), lambda n, c: (c, 0)),
            ],
            out_specs=pl.BlockSpec((1, cout_tile, l_out), lambda n, c: (n, c, 0)),
            scratch_shapes=[pltpu.VMEM((cout_tile, l_out), jnp.float32)],
        ),
        compiler_params=pltpu.CompilerParams(
            dimension_semantics=("parallel", "parallel"),
            vmem_limit_bytes=vmem_limit,
        ),
    )(x_flat, w_taps, b_fold)

    # Drop the 2 "wide" garbage columns per row; row-major reshape is free.  The
    # narrowing slice is one extra HBM pass over the output - consciously accepted
    # (per-row sub-128-lane stores inside the kernel would be worse).
    # TODO(synk): let the downstream consumer read the wide (H, W+2) layout directly
    # to eliminate this pass.
    return out_wide.reshape(N, Cout, H, wp)[:, :, :, :W]


def _reference(x_nchw, w3, b3, w1, b1):
    """Plain-JAX reference: conv3x3(pad=1) + conv1x1, NCHW / HWIO, f32 HIGHEST."""
    dn3 = lax.conv_dimension_numbers(x_nchw.shape, w3.shape, ("NCHW", "HWIO", "NCHW"))
    y3 = lax.conv_general_dilated(x_nchw, w3, (1, 1), ((1, 1), (1, 1)),
                                  dimension_numbers=dn3,
                                  precision=lax.Precision.HIGHEST)
    y3 = y3 + b3.reshape(1, -1, 1, 1)
    w1_4d = w1.reshape(1, 1, *w1.shape)
    dn1 = lax.conv_dimension_numbers(x_nchw.shape, w1_4d.shape, ("NCHW", "HWIO", "NCHW"))
    y1 = lax.conv_general_dilated(x_nchw, w1_4d, (1, 1), ((0, 0), (0, 0)),
                                  dimension_numbers=dn1,
                                  precision=lax.Precision.HIGHEST)
    y1 = y1 + b1.reshape(1, -1, 1, 1)
    return y3 + y1


if __name__ == "__main__":
    # Small shapes consistent with the module's forward
    N, Cin, Cout, H, W = 2, 4, 8, 16, 16

    key = jax.random.PRNGKey(0)
    kx, kw3, kb3, kw1, kb1 = jax.random.split(key, 5)

    x = jax.random.normal(kx, (N, Cin, H, W), dtype=jnp.float32)
    # deterministic, in-script parameter init (shapes from Conv2d(dim, dim_out, 3/1))
    w3 = jax.random.normal(kw3, (3, 3, Cin, Cout), dtype=jnp.float32) * 0.1  # HWIO
    b3 = jax.random.normal(kb3, (Cout,), dtype=jnp.float32) * 0.1
    w1 = jax.random.normal(kw1, (Cin, Cout), dtype=jnp.float32) * 0.1
    b1 = jax.random.normal(kb1, (Cout,), dtype=jnp.float32) * 0.1

    out = jax.block_until_ready(parallel_forward(x, w3, b3, w1, b1))

    # Reference on bf16-rounded operands (kernel uses bf16 MXU operands with f32
    # accumulation and an f32 bias), f32 math at HIGHEST precision.
    bf = jnp.bfloat16
    ref = _reference(x.astype(bf).astype(jnp.float32),
                     w3.astype(bf).astype(jnp.float32), b3,
                     w1.astype(bf).astype(jnp.float32), b1)

    assert out.shape == (N, Cout, H, W)
    assert out.dtype == x.dtype
    assert jnp.allclose(out, ref, atol=2e-2, rtol=2e-2), \
        f"mismatch vs reference, max abs err = {float(jnp.max(jnp.abs(out - ref)))}"

    print("KERNEL_OK")
</pallas_src>

<mosaic_0001>
module attributes {stable_mosaic.version = 11 : i64} {
  func.func @kernel(%arg0: i32, %arg1: i32, %arg2: memref<1x4x342xbf16, #tpu.memory_space<vmem>>, %arg3: memref<9x8x4xbf16, #tpu.memory_space<vmem>>, %arg4: memref<8x1xf32, #tpu.memory_space<vmem>>, %arg5: memref<1x8x288xf32, #tpu.memory_space<vmem>>, %arg6: memref<8x288xf32, #tpu.memory_space<vmem>>) attributes {dimension_semantics = [#tpu.dimension_semantics<parallel>, #tpu.dimension_semantics<parallel>], iteration_bounds = array<i64: 2, 1>, scalar_prefetch = 0 : i64, scratch_operands = 1 : i64, tpu.core_type = #tpu.core_type<tc>, window_params = [{transform_indices = @transform_0, window_bounds = array<i64: 1, 4, 342>}, {transform_indices = @transform_1, window_bounds = array<i64: 9, 8, 4>}, {transform_indices = @transform_2, window_bounds = array<i64: 8, 1>}, {transform_indices = @transform_3, window_bounds = array<i64: 1, 8, 288>}]} {
    %c0 = arith.constant 0 : index
    %c0_0 = arith.constant 0 : index
    %0 = vector.load %arg4[%c0, %c0_0] : memref<8x1xf32, #tpu.memory_space<vmem>>, vector<8x1xf32>
    %c0_1 = arith.constant 0 : index
    %c0_2 = arith.constant 0 : index
    %c0_3 = arith.constant 0 : index
    %1 = vector.load %arg3[%c0_1, %c0_2, %c0_3] : memref<9x8x4xbf16, #tpu.memory_space<vmem>>, vector<1x8x4xbf16>
    %2 = vector.shape_cast %1 : vector<1x8x4xbf16> to vector<8x4xbf16>
    %c0_4 = arith.constant 0 : index
    %c0_5 = arith.constant 0 : index
    %c0_6 = arith.constant 0 : index
    %3 = vector.load %arg2[%c0_4, %c0_5, %c0_6] : memref<1x4x342xbf16, #tpu.memory_space<vmem>>, vector<1x4x288xbf16>
    %4 = vector.shape_cast %3 : vector<1x4x288xbf16> to vector<4x288xbf16>
    %cst = arith.constant dense<0.000000e+00> : vector<8x288xf32>
    %5 = tpu.matmul %2, %4, %cst {dimension_numbers = #tpu.dot_dimension_numbers<[1], [0], [0], [1], [0, 0, 1, 1], [], []>} : vector<8x4xbf16>, vector<4x288xbf16>, vector<8x288xf32> -> vector<8x288xf32>
    %6 = vector.broadcast %0 : vector<8x1xf32> to vector<8x288xf32>
    %7 = arith.addf %6, %5 : vector<8x288xf32>
    %c0_7 = arith.constant 0 : index
    %c0_8 = arith.constant 0 : index
    %8 = vector.load %arg6[%c0_7, %c0_8] : memref<8x288xf32, #tpu.memory_space<vmem>>, vector<8x288xf32>
    tpu.vector_store %arg6[%c0_7, %c0_8], %7 {strides = array<i32>} : memref<8x288xf32, #tpu.memory_space<vmem>>, vector<8x288xf32>,
    %c0_9 = arith.constant 0 : index
    %c0_10 = arith.constant 0 : index
    %9 = vector.load %arg6[%c0_9, %c0_10] : memref<8x288xf32, #tpu.memory_space<vmem>>, vector<8x288xf32>
    %c1 = arith.constant 1 : index
    %c0_11 = arith.constant 0 : index
    %c0_12 = arith.constant 0 : index
    %10 = vector.load %arg3[%c1, %c0_11, %c0_12] : memref<9x8x4xbf16, #tpu.memory_space<vmem>>, vector<1x8x4xbf16>
    %11 = vector.shape_cast %10 : vector<1x8x4xbf16> to vector<8x4xbf16>
    %c0_13 = arith.constant 0 : index
    %c0_14 = arith.constant 0 : index
    %c1_15 = arith.constant 1 : index
    %12 = vector.load %arg2[%c0_13, %c0_14, %c1_15] : memref<1x4x342xbf16, #tpu.memory_space<vmem>>, vector<1x4x288xbf16>
    %13 = vector.shape_cast %12 : vector<1x4x288xbf16> to vector<4x288xbf16>
    %cst_16 = arith.constant dense<0.000000e+00> : vector<8x288xf32>
    %14 = tpu.matmul %11, %13, %cst_16 {dimension_numbers = #tpu.dot_dimension_numbers<[1], [0], [0], [1], [0, 0, 1, 1], [], []>} : vector<8x4xbf16>, vector<4x288xbf16>, vector<8x288xf32> -> vector<8x288xf32>
    %15 = arith.addf %9, %14 : vector<8x288xf32>
    %c0_17 = arith.constant 0 : index
    %c0_18 = arith.constant 0 : index
    %16 = vector.load %arg6[%c0_17, %c0_18] : memref<8x288xf32, #tpu.memory_space<vmem>>, vector<8x288xf32>
    tpu.vector_store %arg6[%c0_17, %c0_18], %15 {strides = array<i32>} : memref<8x288xf32, #tpu.memory_space<vmem>>, vector<8x288xf32>,
    %c0_19 = arith.constant 0 : index
    %c0_20 = arith.constant 0 : index
    %17 = vector.load %arg6[%c0_19, %c0_20] : memref<8x288xf32, #tpu.memory_space<vmem>>, vector<8x288xf32>
    %c2 = arith.constant 2 : index
    %c0_21 = arith.constant 0 : index
    %c0_22 = arith.constant 0 : index
    %18 = vector.load %arg3[%c2, %c0_21, %c0_22] : memref<9x8x4xbf16, #tpu.memory_space<vmem>>, vector<1x8x4xbf16>
    %19 = vector.shape_cast %18 : vector<1x8x4xbf16> to vector<8x4xbf16>
    %c0_23 = arith.constant 0 : index
    %c0_24 = arith.constant 0 : index
    %c2_25 = arith.constant 2 : index
    %20 = vector.load %arg2[%c0_23, %c0_24, %c2_25] : memref<1x4x342xbf16, #tpu.memory_space<vmem>>, vector<1x4x288xbf16>
    %21 = vector.shape_cast %20 : vector<1x4x288xbf16> to vector<4x288xbf16>
    %cst_26 = arith.constant dense<0.000000e+00> : vector<8x288xf32>
    %22 = tpu.matmul %19, %21, %cst_26 {dimension_numbers = #tpu.dot_dimension_numbers<[1], [0], [0], [1], [0, 0, 1, 1], [], []>} : vector<8x4xbf16>, vector<4x288xbf16>, vector<8x288xf32> -> vector<8x288xf32>
    %23 = arith.addf %17, %22 : vector<8x288xf32>
    %c0_27 = arith.constant 0 : index
    %c0_28 = arith.constant 0 : index
    %24 = vector.load %arg6[%c0_27, %c0_28] : memref<8x288xf32, #tpu.memory_space<vmem>>, vector<8x288xf32>
    tpu.vector_store %arg6[%c0_27, %c0_28], %23 {strides = array<i32>} : memref<8x288xf32, #tpu.memory_space<vmem>>, vector<8x288xf32>,
    %c0_29 = arith.constant 0 : index
    %c0_30 = arith.constant 0 : index
    %25 = vector.load %arg6[%c0_29, %c0_30] : memref<8x288xf32, #tpu.memory_space<vmem>>, vector<8x288xf32>
    %c3 = arith.constant 3 : index
    %c0_31 = arith.constant 0 : index
    %c0_32 = arith.constant 0 : index
    %26 = vector.load %arg3[%c3, %c0_31, %c0_32] : memref<9x8x4xbf16, #tpu.memory_space<vmem>>, vector<1x8x4xbf16>
    %27 = vector.shape_cast %26 : vector<1x8x4xbf16> to vector<8x4xbf16>
    %c0_33 = arith.constant 0 : index
    %c0_34 = arith.constant 0 : index
    %c18 = arith.constant 18 : index
    %28 = vector.load %arg2[%c0_33, %c0_34, %c18] : memref<1x4x342xbf16, #tpu.memory_space<vmem>>, vector<1x4x288xbf16>
    %29 = vector.shape_cast %28 : vector<1x4x288xbf16> to vector<4x288xbf16>
    %cst_35 = arith.constant dense<0.000000e+00> : vector<8x288xf32>
    %30 = tpu.matmul %27, %29, %cst_35 {dimension_numbers = #tpu.dot_dimension_numbers<[1], [0], [0], [1], [0, 0, 1, 1], [], []>} : vector<8x4xbf16>, vector<4x288xbf16>, vector<8x288xf32> -> vector<8x288xf32>
    %31 = arith.addf %25, %30 : vector<8x288xf32>
    %c0_36 = arith.constant 0 : index
    %c0_37 = arith.constant 0 : index
    %32 = vector.load %arg6[%c0_36, %c0_37] : memref<8x288xf32, #tpu.memory_space<vmem>>, vector<8x288xf32>
    tpu.vector_store %arg6[%c0_36, %c0_37], %31 {strides = array<i32>} : memref<8x288xf32, #tpu.memory_space<vmem>>, vector<8x288xf32>,
    %c0_38 = arith.constant 0 : index
    %c0_39 = arith.constant 0 : index
    %33 = vector.load %arg6[%c0_38, %c0_39] : memref<8x288xf32, #tpu.memory_space<vmem>>, vector<8x288xf32>
    %c4 = arith.constant 4 : index
    %c0_40 = arith.constant 0 : index
    %c0_41 = arith.constant 0 : index
    %34 = vector.load %arg3[%c4, %c0_40, %c0_41] : memref<9x8x4xbf16, #tpu.memory_space<vmem>>, vector<1x8x4xbf16>
    %35 = vector.shape_cast %34 : vector<1x8x4xbf16> to vector<8x4xbf16>
    %c0_42 = arith.constant 0 : index
    %c0_43 = arith.constant 0 : index
    %c19 = arith.constant 19 : index
    %36 = vector.load %arg2[%c0_42, %c0_43, %c19] : memref<1x4x342xbf16, #tpu.memory_space<vmem>>, vector<1x4x288xbf16>
    %37 = vector.shape_cast %36 : vector<1x4x288xbf16> to vector<4x288xbf16>
    %cst_44 = arith.constant dense<0.000000e+00> : vector<8x288xf32>
    %38 = tpu.matmul %35, %37, %cst_44 {dimension_numbers = #tpu.dot_dimension_numbers<[1], [0], [0], [1], [0, 0, 1, 1], [], []>} : vector<8x4xbf16>, vector<4x288xbf16>, vector<8x288xf32> -> vector<8x288xf32>
    %39 = arith.addf %33, %38 : vector<8x288xf32>
    %c0_45 = arith.constant 0 : index
    %c0_46 = arith.constant 0 : index
    %40 = vector.load %arg6[%c0_45, %c0_46] : memref<8x288xf32, #tpu.memory_space<vmem>>, vector<8x288xf32>
    tpu.vector_store %arg6[%c0_45, %c0_46], %39 {strides = array<i32>} : memref<8x288xf32, #tpu.memory_space<vmem>>, vector<8x288xf32>,
    %c0_47 = arith.constant 0 : index
    %c0_48 = arith.constant 0 : index
    %41 = vector.load %arg6[%c0_47, %c0_48] : memref<8x288xf32, #tpu.memory_space<vmem>>, vector<8x288xf32>
    %c5 = arith.constant 5 : index
    %c0_49 = arith.constant 0 : index
    %c0_50 = arith.constant 0 : index
    %42 = vector.load %arg3[%c5, %c0_49, %c0_50] : memref<9x8x4xbf16, #tpu.memory_space<vmem>>, vector<1x8x4xbf16>
    %43 = vector.shape_cast %42 : vector<1x8x4xbf16> to vector<8x4xbf16>
    %c0_51 = arith.constant 0 : index
    %c0_52 = arith.constant 0 : index
    %c20 = arith.constant 20 : index
    %44 = vector.load %arg2[%c0_51, %c0_52, %c20] : memref<1x4x342xbf16, #tpu.memory_space<vmem>>, vector<1x4x288xbf16>
    %45 = vector.shape_cast %44 : vector<1x4x288xbf16> to vector<4x288xbf16>
    %cst_53 = arith.constant dense<0.000000e+00> : vector<8x288xf32>
    %46 = tpu.matmul %43, %45, %cst_53 {dimension_numbers = #tpu.dot_dimension_numbers<[1], [0], [0], [1], [0, 0, 1, 1], [], []>} : vector<8x4xbf16>, vector<4x288xbf16>, vector<8x288xf32> -> vector<8x288xf32>
    %47 = arith.addf %41, %46 : vector<8x288xf32>
    %c0_54 = arith.constant 0 : index
    %c0_55 = arith.constant 0 : index
    %48 = vector.load %arg6[%c0_54, %c0_55] : memref<8x288xf32, #tpu.memory_space<vmem>>, vector<8x288xf32>
    tpu.vector_store %arg6[%c0_54, %c0_55], %47 {strides = array<i32>} : memref<8x288xf32, #tpu.memory_space<vmem>>, vector<8x288xf32>,
    %c0_56 = arith.constant 0 : index
    %c0_57 = arith.constant 0 : index
    %49 = vector.load %arg6[%c0_56, %c0_57] : memref<8x288xf32, #tpu.memory_space<vmem>>, vector<8x288xf32>
    %c6 = arith.constant 6 : index
    %c0_58 = arith.constant 0 : index
    %c0_59 = arith.constant 0 : index
    %50 = vector.load %arg3[%c6, %c0_58, %c0_59] : memref<9x8x4xbf16, #tpu.memory_space<vmem>>, vector<1x8x4xbf16>
    %51 = vector.shape_cast %50 : vector<1x8x4xbf16> to vector<8x4xbf16>
    %c0_60 = arith.constant 0 : index
    %c0_61 = arith.constant 0 : index
    %c36 = arith.constant 36 : index
    %52 = vector.load %arg2[%c0_60, %c0_61, %c36] : memref<1x4x342xbf16, #tpu.memory_space<vmem>>, vector<1x4x288xbf16>
    %53 = vector.shape_cast %52 : vector<1x4x288xbf16> to vector<4x288xbf16>
    %cst_62 = arith.constant dense<0.000000e+00> : vector<8x288xf32>
    %54 = tpu.matmul %51, %53, %cst_62 {dimension_numbers = #tpu.dot_dimension_numbers<[1], [0], [0], [1], [0, 0, 1, 1], [], []>} : vector<8x4xbf16>, vector<4x288xbf16>, vector<8x288xf32> -> vector<8x288xf32>
    %55 = arith.addf %49, %54 : vector<8x288xf32>
    %c0_63 = arith.constant 0 : index
    %c0_64 = arith.constant 0 : index
    %56 = vector.load %arg6[%c0_63, %c0_64] : memref<8x288xf32, #tpu.memory_space<vmem>>, vector<8x288xf32>
    tpu.vector_store %arg6[%c0_63, %c0_64], %55 {strides = array<i32>} : memref<8x288xf32, #tpu.memory_space<vmem>>, vector<8x288xf32>,
    %c0_65 = arith.constant 0 : index
    %c0_66 = arith.constant 0 : index
    %57 = vector.load %arg6[%c0_65, %c0_66] : memref<8x288xf32, #tpu.memory_space<vmem>>, vector<8x288xf32>
    %c7 = arith.constant 7 : index
    %c0_67 = arith.constant 0 : index
    %c0_68 = arith.constant 0 : index
    %58 = vector.load %arg3[%c7, %c0_67, %c0_68] : memref<9x8x4xbf16, #tpu.memory_space<vmem>>, vector<1x8x4xbf16>
    %59 = vector.shape_cast %58 : vector<1x8x4xbf16> to vector<8x4xbf16>
    %c0_69 = arith.constant 0 : index
    %c0_70 = arith.constant 0 : index
    %c37 = arith.constant 37 : index
    %60 = vector.load %arg2[%c0_69, %c0_70, %c37] : memref<1x4x342xbf16, #tpu.memory_space<vmem>>, vector<1x4x288xbf16>
    %61 = vector.shape_cast %60 : vector<1x4x288xbf16> to vector<4x288xbf16>
    %cst_71 = arith.constant dense<0.000000e+00> : vector<8x288xf32>
    %62 = tpu.matmul %59, %61, %cst_71 {dimension_numbers = #tpu.dot_dimension_numbers<[1], [0], [0], [1], [0, 0, 1, 1], [], []>} : vector<8x4xbf16>, vector<4x288xbf16>, vector<8x288xf32> -> vector<8x288xf32>
    %63 = arith.addf %57, %62 : vector<8x288xf32>
    %c0_72 = arith.constant 0 : index
    %c0_73 = arith.constant 0 : index
    %64 = vector.load %arg6[%c0_72, %c0_73] : memref<8x288xf32, #tpu.memory_space<vmem>>, vector<8x288xf32>
    tpu.vector_store %arg6[%c0_72, %c0_73], %63 {strides = array<i32>} : memref<8x288xf32, #tpu.memory_space<vmem>>, vector<8x288xf32>,
    %c0_74 = arith.constant 0 : index
    %c0_75 = arith.constant 0 : index
    %65 = vector.load %arg6[%c0_74, %c0_75] : memref<8x288xf32, #tpu.memory_space<vmem>>, vector<8x288xf32>
    %c8 = arith.constant 8 : index
    %c0_76 = arith.constant 0 : index
    %c0_77 = arith.constant 0 : index
    %66 = vector.load %arg3[%c8, %c0_76, %c0_77] : memref<9x8x4xbf16, #tpu.memory_space<vmem>>, vector<1x8x4xbf16>
    %67 = vector.shape_cast %66 : vector<1x8x4xbf16> to vector<8x4xbf16>
    %c0_78 = arith.constant 0 : index
    %c0_79 = arith.constant 0 : index
    %c38 = arith.constant 38 : index
    %68 = vector.load %arg2[%c0_78, %c0_79, %c38] : memref<1x4x342xbf16, #tpu.memory_space<vmem>>, vector<1x4x288xbf16>
    %69 = vector.shape_cast %68 : vector<1x4x288xbf16> to vector<4x288xbf16>
    %cst_80 = arith.constant dense<0.000000e+00> : vector<8x288xf32>
    %70 = tpu.matmul %67, %69, %cst_80 {dimension_numbers = #tpu.dot_dimension_numbers<[1], [0], [0], [1], [0, 0, 1, 1], [], []>} : vector<8x4xbf16>, vector<4x288xbf16>, vector<8x288xf32> -> vector<8x288xf32>
    %71 = arith.addf %65, %70 : vector<8x288xf32>
    %c0_81 = arith.constant 0 : index
    %c0_82 = arith.constant 0 : index
    %72 = vector.load %arg6[%c0_81, %c0_82] : memref<8x288xf32, #tpu.memory_space<vmem>>, vector<8x288xf32>
    tpu.vector_store %arg6[%c0_81, %c0_82], %71 {strides = array<i32>} : memref<8x288xf32, #tpu.memory_space<vmem>>, vector<8x288xf32>,
    %c0_83 = arith.constant 0 : index
    %c0_84 = arith.constant 0 : index
    %73 = vector.load %arg6[%c0_83, %c0_84] : memref<8x288xf32, #tpu.memory_space<vmem>>, vector<8x288xf32>
    %74 = vector.shape_cast %73 : vector<8x288xf32> to vector<1x8x288xf32>
    %c0_85 = arith.constant 0 : index
    %c0_86 = arith.constant 0 : index
    %c0_87 = arith.constant 0 : index
    %75 = vector.load %arg5[%c0_85, %c0_86, %c0_87] : memref<1x8x288xf32, #tpu.memory_space<vmem>>, vector<1x8x288xf32>
    tpu.vector_store %arg5[%c0_85, %c0_86, %c0_87], %74 {strides = array<i32>} : memref<1x8x288xf32, #tpu.memory_space<vmem>>, vector<1x8x288xf32>,
    return
  }
  func.func @transform_0(%arg0: i32, %arg1: i32) -> (i32, i32, i32) {
    %c0_i32 = arith.constant 0 : i32
    %c0_i32_0 = arith.constant 0 : i32
    %c0_i32_1 = arith.constant 0 : i32
    return %arg0, %c0_i32, %c0_i32_0 : i32, i32, i32
  }
  func.func @transform_1(%arg0: i32, %arg1: i32) -> (i32, i32, i32) {
    %c0_i32 = arith.constant 0 : i32
    %c0_i32_0 = arith.constant 0 : i32
    %c0_i32_1 = arith.constant 0 : i32
    return %c0_i32, %arg1, %c0_i32_0 : i32, i32, i32
  }
  func.func @transform_2(%arg0: i32, %arg1: i32) -> (i32, i32) {
    %c0_i32 = arith.constant 0 : i32
    %c0_i32_0 = arith.constant 0 : i32
    return %arg1, %c0_i32 : i32, i32
  }
  func.func @transform_3(%arg0: i32, %arg1: i32) -> (i32, i32, i32) {
    %c0_i32 = arith.constant 0 : i32
    %c0_i32_0 = arith.constant 0 : i32
    return %arg0, %arg1, %c0_i32 : i32, i32, i32
  }
}

</mosaic_0001>

<bundles_post_ra>
// kernel: tpu_custom_call.1
= control target key start
LH: loop header
LB: loop body
LE: loop exit
PB: predicated region body
PF: predicated region fallthrough
CT: control target
= control target key end

     0   :  { %8 = vsyncpa [#allocation4], 0  ;;  %s2095_s0 = inlined_call_operand.vmem [shape: bf16[2,4,342], index: 0, kind: input, shape index: {}]   ;;  %s2096_s1 = inlined_call_operand.vmem [shape: bf16[9,8,4], index: 1, kind: input, shape index: {}]   ;;  %s2097_s2 = inlined_call_operand.vmem [shape: f32[8,1], index: 2, kind: input, shape index: {}]   ;;  %s2098_s3 = inlined_call_operand.hbm [shape: f32[2,8,288], index: 3, kind: output, shape index: {}]  }
   0x1   :  { %10 = vsyncpa [#allocation4 + $0x1], 0  ;;  %s1825_s12 = smov 0   ;;  %s1827_s13 = smov 0  }
   0x2   :  { %s1829_s14 = smov 0   ;;  %s1831_s15 = smov 0  }
   0x3   :  { %s1833_s16 = smov 0   ;;  %s1835_s17 = smov 0  }
   0x4 LB: > { %s1516_s18 = sadd.s32 4294967295, %s1790_s17   ;;  %s1517_s19 = sadd.s32 4294967294, %s1790_s17   ;;  %s1790_s17 = sphi %s1835_s17, %s16_s17   ;;  %s1786_s16 = sphi %s1833_s16, %s2105_s16   ;;  %s1782_s15 = sphi %s1831_s15, %s2104_s15   ;;  %s1778_s14 = sphi %s1829_s14, %s2103_s14   ;;  %s1774_s13 = sphi %s1827_s13, %s2102_s13   ;;  %s1770_s12 = sphi %s1825_s12, %s2101_s12  }
   0x5   : > { %s28_s20 = sadd.s32 1, %s1786_s16  ;;  %s115_s21 = sadd.s32 1, %s1778_s14 }
   0x6   : > { %p30_p0 = scmp.ge.s32.totalorder %s28_s20, 2  ;;  %p125_p1 = scmp.ne.s32.totalorder %s1778_s14, %s1774_s13 }
   0x7   : > { %p126_p2 = scmp.eq.s32.totalorder %s1516_s18, 1  ;;  %p131_p3 = scmp.ne.s32.totalorder %s1774_s13, %s1770_s12 }
   0x8   : > { %s2107_s20 = smov (%p30_p0, %s28_s20), 0  ;;  %p132_p5 = scmp.eq.s32.totalorder %s1517_s19, 1 }
   0x9   : > { %p1865_p4 = por %p126_p2, %p125_p1  ;;  %s110_s23 = ssub.s32 %s1786_s16, %s2107_s20 }
   0xa   : > { %p1522_p6 = scmp.ge.s32.totalorder %s1790_s17, 1  ;;  %p113_p7 = scmp.eq.s32.totalorder %s110_s23, 0 }
   0xb   : > { %p1872_p8 = por %p132_p5, %p131_p3  ;;  %p172_p9 = scmp.lt.s32.totalorder %s1790_s17, 3 }
   0xc   : > { %s1878_s25 = scalar_select %p113_p7, %s1778_s14, %s115_s21  }
   0xd   : > { %p173_p10 = pnand %p1522_p6, %p172_p9 }
   0xe   : > { %p204_p11 = scmp.lt.s32.totalorder (!%p173_p10), %s1782_s15, 1  ;;  %s1796_s4 = smov (!%p173_p10), 127  }
   0xf   : > { %176 = sbr.rel (%p173_p10) target bundleno = 435 (0x1b3), region = 32  ;;  %s1797_s5 = smov (!%p173_p10), 126  }
  0x10   : > { %s1798_s6 = smov (!%p173_p10), 110   ;;  %s1799_s9 = smov (!%p173_p10), 109  }
  0x11   : > { %s1800_s10 = smov (!%p173_p10), 108   ;;  %s1801_s11 = smov (!%p173_p10), 92  }
  0x12   : > { %s1802_s18 = smov (!%p173_p10), 91   ;;  %s1803_s19 = smov (!%p173_p10), 90  }
  0x13   : > { %s201_s23 = sand.u32 (!%p173_p10), 1, %s1774_s13   ;;  %s1636_s28 = smul.u32 (!%p173_p10), 384, %s1782_s15 }
  0x14   : > { %v226_v0 = vlaneseq  ;;  %v1792_v1 = vmov 1983009808   ;;  %v1793_v3 = vmov 0.0   ;;  %s205_s26 = scalar_select %p204_p11, %s1782_s15, 1  ;;  %v1794_v5 = vmov 0   ;;  %v218_v56 = vld [vmem:[%s2097_s2] sm:$0xff] }
  0x15   : > { %v224_v2 = vunpack.c.l.s4 %v1792_v1  ;;  %1580 = vmatprep.subr.bf16.mxu1 %v1793_v3  ;;  %284 = vmatprep.mubr.bf16.mxu0 %v1794_v5  ;;  %vm1795_vm0 = vmmov 0   ;;  %vm242_vm1 = vcmask 1041408   ;;  %v219_v31 = vld [vmem:[%s2096_s1] sm:$0xf]  ;;  %vm238_vm2 = vcmask 31744   ;;  %s1804_s8 = smov [#allocation3]  }
  0x16   : > { %v227_v4 = vshrl.u32 %v226_v0, 7  ;;  %1704 = vset.pattern.permute.xlu0 %v1794_v5  ;;  %1582 = vmatprep.mubr.msk.bf16.mxu1 %vm1795_vm0, %v1793_v3  ;;  %s1635_s27 = smul.u32 6, %s205_s26  ;;  %vm374_vm3 = vcmask 1039360   ;;  %v1527_v61 = vld [vmem:[%s2096_s1 + $0x4] sm:$0xf]  ;;  %vm505_vm4 = vcmask 1031168  }
  0x17   : > { %v225_v6 = vunpack.c.0.s8 %v224_v2  ;;  %vm636_vm5 = vcmask 900096   ;;  %vm767_vm6 = vcmask 891904   ;;  %vm898_vm7 = vcmask 883712   ;;  %s1634_s26 = smul.u32 24, %s201_s23 }
  0x18   : > { %s1892_s30 = scalar_lea.vmem %s2095_s0, %s1635_s27  ;;  %vm1029_vm8 = vcmask 752640   ;;  %vm1160_vm9 = vcmask 744448   ;;  %vm1291_vm10 = vcmask 736256   ;;  %vm343_vm11 = vcmask 261120  }
  0x19   : > { %v1887_v7 = vsub.s32 %v225_v6, %v227_v4  ;;  %v350_v8 = vld [vmem:[%s1892_s30] sm:$0x3f]  ;;  %s203_s27 = scalar_lea.vmem [#allocation3], %s1634_s26 }
  0x1a   : > { %v481_v9 = vld [vmem:[%s1892_s30] sm:$0x3f]  ;;  %v352_v11 = vcombine.high %v350_v8, %v350_v8  ;;  %s1416_s29 = sshll.u32 %s203_s27, 4  ;;  %s1417_s29 = int_to_ptr.vmem [resolvable:$true] %s1416_s29 }
  0x1b   : > { %v359_v10 = vrot.slane %v350_v8, %v1887_v7  ;;  %v490_v14 = vrot.slane %v481_v9, %v1887_v7  ;;  %v483_v15 = vcombine.high %v481_v9, %v481_v9  ;;  %v220_v16 = vld [vmem:[%s1892_s30] sm:$0x3f]  ;;  %s1714_s7 = scalar_lea.vmem %s1417_s29, 384 }
  0x1c   : > { %v366_v13 = vrot.slane %v352_v11, %v1887_v7  ;;  %v612_v18 = vld [vmem:[%s1892_s30] sm:$0x3f]  ;;  %v229_v20 = vrot.slane %v220_v16, %v1887_v7  ;;  %v222_v21 = vcombine.high %v220_v16, %v220_v16  ;;  %v1531_v11 = vld [vmem:[%s2096_s1 + $0x8] sm:$0xf]  ;;  %p1715_p12 = scmp.ne.s32.totalorder %s1417_s29, %s1714_s7 }
  0x1d   : > { %368 = vrot.lane.b32.xlu0 %v359_v10, %s1796_s4  ;;  %v367_v12 = vcombine.high %v359_v10, %v359_v10  ;;  %v498_v17 = vcombine.high %v490_v14, %v490_v14  ;;  %v497_v19 = vrot.slane %v483_v15, %v1887_v7  ;;  %v621_v22 = vrot.slane %v612_v18, %v1887_v7  ;;  %v743_v29 = vld [vmem:[%s1892_s30] sm:$0x3f] }
  0x1e   : > { %372 = vrot.lane.b32.xlu1 %v366_v13, %s1796_s4  ;;  %v614_v23 = vcombine.high %v612_v18, %v612_v18  ;;  %v237_v24 = vcombine.high %v229_v20, %v229_v20  ;;  %v244_v25 = vsel %vm242_vm1, %v229_v20, 0  ;;  %v236_v26 = vrot.slane %v222_v21, %v1887_v7  ;;  %v874_v35 = vld [vmem:[%s1892_s30] sm:$0x3f]  ;;  %p1716_p13 = pnand %p1715_p12, %p1865_p4 }
  0x1f   : > { %v629_v27 = vcombine.high %v621_v22, %v621_v22  ;;  %v752_v32 = vrot.slane %v743_v29, %v1887_v7  ;;  %v745_v33 = vcombine.high %v743_v29, %v743_v29  ;;  %v883_v37 = vrot.slane %v874_v35, %v1887_v7  ;;  %v1005_v40 = vld [vmem:[%s1892_s30] sm:$0x3f] }
  0x20   : > { %1524 = vmatprep.subr.msk.bf16.mxu0 %vm242_vm1, %v237_v24  ;;  %v250_v28 = vsel %vm242_vm1, %v236_v26, 0  ;;  %v628_v30 = vrot.slane %v614_v23, %v1887_v7  ;;  %v876_v38 = vcombine.high %v874_v35, %v874_v35  ;;  %v1014_v42 = vrot.slane %v1005_v40, %v1887_v7  ;;  %v1136_v45 = vld [vmem:[%s1892_s30] sm:$0x3f]  ;;  %p1717_p0 = pneg %p1716_p13 }
  0x21   : > { %370 = vrot.lane.b32.xlu0 %v367_v12, %s1796_s4  ;;  %267 = vmatpush1.bf16.msra.mxu0 %v244_v25  ;;  %v760_v34 = vcombine.high %v752_v32, %v752_v32  ;;  %v759_v36 = vrot.slane %v745_v33, %v1887_v7  ;;  %v891_v39 = vcombine.high %v883_v37, %v883_v37  ;;  %v1267_v50 = vld [vmem:[%s1892_s30] sm:$0x3f] }
  0x22   : > { %499 = vrot.lane.b32.xlu1 %v490_v14, %s1797_s5  ;;  %1581 = vmatpush3.bf16.msra.mxu1 %v250_v28  ;;  %v890_v41 = vrot.slane %v876_v38, %v1887_v7  ;;  %v1007_v43 = vcombine.high %v1005_v40, %v1005_v40  ;;  %v1022_v44 = vcombine.high %v1014_v42, %v1014_v42  ;;  %v1539_v28 = vld [vmem:[%s2096_s1 + $0x10] sm:$0xf]  ;;  %v1543_v38 = vld [vmem:[%s2096_s1 + $0x14] sm:$0xf] }
  0x23   : > { %1586 = vmatprep.subr.bf16.mxu1 %v1793_v3  ;;  %v1145_v47 = vrot.slane %v1136_v45, %v1887_v7  ;;  %v1138_v48 = vcombine.high %v1136_v45, %v1136_v45  ;;  %v1276_v52 = vrot.slane %v1267_v50, %v1887_v7  ;;  %v1269_v53 = vcombine.high %v1267_v50, %v1267_v50 }
  0x24   : > { %1525 = vmatmul.mubr.msk.bf16.vlgmr.msra.gmra.mxu0 %vm238_vm2, %v219_v31  ;;  %v1021_v46 = vrot.slane %v1007_v43, %v1887_v7 }
  0x25   : > { %501 = vrot.lane.b32.xlu0 %v498_v17, %s1797_s5  ;;  %1583 = vmatmul.mubr.msk.bf16.vlgmr.msra.gmra.mxu1 %vm238_vm2, %v219_v31  ;;  %v1153_v49 = vcombine.high %v1145_v47, %v1145_v47  ;;  %v1152_v51 = vrot.slane %v1138_v48, %v1887_v7  ;;  %v1284_v54 = vcombine.high %v1276_v52, %v1276_v52 }
  0x26   : > { %503 = vrot.lane.b32.xlu1 %v497_v19, %s1797_s5  ;;  %421 = vmatprep.mubr.bf16.mxu0 %v1794_v5  ;;  %v1283_v55 = vrot.slane %v1269_v53, %v1887_v7  ;;  %v1535_v19 = vld [vmem:[%s2096_s1 + $0xc] sm:$0xf]  ;;  %s2052_s5 = scalar_lea.hbm %s2098_s3, %s1636_s28 }
  0x27   : > { %1588 = vmatprep.mubr.msk.bf16.mxu1 %vm1795_vm0, %v1793_v3 }
  0x29   : > { %630 = vrot.lane.b32.xlu0 %v621_v22, %s1798_s6 }
  0x2a   : > { %632 = vrot.lane.b32.xlu1 %v629_v27, %s1798_s6 }
  0x2d   : > { %634 = vrot.lane.b32.xlu0 %v628_v30, %s1798_s6  ;;  %s1400_s6 = scalar_lea.sflag [#allocation4], %s201_s23 }
  0x2e   : > { %761 = vrot.lane.b32.xlu1 %v752_v32, %s1799_s9 }
  0x31   : > { %763 = vrot.lane.b32.xlu0 %v760_v34, %s1799_s9 }
  0x32   : > { %765 = vrot.lane.b32.xlu1 %v759_v36, %s1799_s9  ;;  %s1718_s9 = sshll.u32 %s1804_s8, 4  ;;  %s1719_s9 = int_to_ptr.vmem [resolvable:$false] %s1718_s9 }
  0x33   : > { %s1720_s15 = scalar_lea.vmem %s1719_s9, 768  ;;  %p1721_p1 = scmp.lt.s32.totalorder %s1417_s29, %s1719_s9 }
  0x34   : > { %p1722_p2 = scmp.lt.s32.totalorder %s1720_s15, %s1714_s7 }
  0x35   : > { %892 = vrot.lane.b32.xlu0 %v883_v37, %s1800_s10 }
  0x36   : > { %894 = vrot.lane.b32.xlu1 %v891_v39, %s1800_s10  ;;  %p1723_p3 = por %p1722_p2, %p1721_p1 }
  0x38   : > { %p1724_p5 = pnand %p1723_p3, %p1717_p0 }
  0x39   : > { %896 = vrot.lane.b32.xlu0 %v890_v41, %s1800_s10 }
  0x3a   : > { %1023 = vrot.lane.b32.xlu1 %v1014_v42, %s1801_s11 }
  0x3d   : > { %1025 = vrot.lane.b32.xlu0 %v1022_v44, %s1801_s11 }
  0x3e   : > { %1027 = vrot.lane.b32.xlu1 %v1021_v46, %s1801_s11 }
  0x41   : > { %1154 = vrot.lane.b32.xlu0 %v1145_v47, %s1802_s18  ;;  %v1547_v47 = vld [vmem:[%s2096_s1 + $0x18] sm:$0xf] }
  0x42   : > { %1156 = vrot.lane.b32.xlu1 %v1153_v49, %s1802_s18 }
  0x45   : > { %1158 = vrot.lane.b32.xlu0 %v1152_v51, %s1802_s18 }
  0x46   : > { %1285 = vrot.lane.b32.xlu1 %v1276_v52, %s1803_s19 }
  0x49   : > { %1287 = vrot.lane.b32.xlu0 %v1284_v54, %s1803_s19 }
  0x4a   : > { %1289 = vrot.lane.b32.xlu1 %v1283_v55, %s1803_s19 }
  0x4d   : > { %335 = vperm.xlu0 %1704, %v218_v56   ;;  %v1551_v56 = vld [vmem:[%s2096_s1 + $0x1c] sm:$0xf] }
  0x8f   : > { %v369_v57 = vpop.permute.xlu0 %368 }
  0x90   : > { %v373_v58 = vpop.permute.xlu1 %372 }
  0x91   : > { %v387_v59 = vsel %vm242_vm1, %v373_v58, 0 }
  0x92   : > { %1587 = vmatpush3.bf16.msra.mxu1 %v387_v59 }
  0x93   : > { %v371_v60 = vpop.permute.xlu0 %370  ;;  %1592 = vmatprep.subr.bf16.mxu1 %v1793_v3 }
  0x94   : > { %v375_v62 = vsel %vm374_vm3, %v369_v57, %v371_v60  ;;  %v376_v63 = vsel %vm374_vm3, %v371_v60, %v373_v58  ;;  %v500_v1 = vpop.permute.xlu1 %499  ;;  %v1555_v58 = vld [vmem:[%s2096_s1 + $0x20] sm:$0xf] }
  0x95   : > { %v381_v0 = vsel %vm242_vm1, %v375_v62, 0  ;;  %1528 = vmatprep.subr.msk.bf16.mxu0 %vm242_vm1, %v376_v63  ;;  %1589 = vmatmul.mubr.msk.bf16.vlgmr.msra.gmra.mxu1 %vm238_vm2, %v1527_v61 }
  0x96   : > { %404 = vmatpush1.bf16.msra.mxu0 %v381_v0  ;;  %1594 = vmatprep.mubr.msk.bf16.mxu1 %vm1795_vm0, %v1793_v3 }
  0x97   : > { %v502_v2 = vpop.permute.xlu0 %501 }
  0x98   : > { %v506_v4 = vsel %vm505_vm4, %v500_v1, %v502_v2  ;;  %v504_v6 = vpop.permute.xlu1 %503 }
  0x99   : > { %1529 = vmatmul.mubr.msk.bf16.vlgmr.msra.gmra.mxu0 %vm238_vm2, %v1527_v61  ;;  %v507_v7 = vsel %vm505_vm4, %v502_v2, %v504_v6  ;;  %v518_v8 = vsel %vm242_vm1, %v504_v6, 0  ;;  %v512_v9 = vsel %vm242_vm1, %v506_v4, 0 }
  0x9a   : > { %552 = vmatprep.mubr.bf16.mxu0 %v1794_v5  ;;  %1532 = vmatprep.subr.msk.bf16.mxu0 %vm242_vm1, %v507_v7 }
  0x9b   : > { %v631_v10 = vpop.permute.xlu0 %630  ;;  %1593 = vmatpush3.bf16.msra.mxu1 %v518_v8  ;;  %535 = vmatpush1.bf16.msra.mxu0 %v512_v9 }
  0x9c   : > { %1598 = vmatprep.subr.bf16.mxu1 %v1793_v3  ;;  %v633_v12 = vpop.permute.xlu1 %632 }
  0x9d   : > { %v637_v13 = vsel %vm636_vm5, %v631_v10, %v633_v12 }
  0x9e   : > { %1595 = vmatmul.mubr.msk.bf16.vlgmr.msra.gmra.mxu1 %vm238_vm2, %v1531_v11  ;;  %v643_v15 = vsel %vm242_vm1, %v637_v13, 0 }
  0x9f   : > { %v635_v14 = vpop.permute.xlu0 %634  ;;  %1600 = vmatprep.mubr.msk.bf16.mxu1 %vm1795_vm0, %v1793_v3 }
  0xa0   : > { %v649_v16 = vsel %vm242_vm1, %v635_v14, 0  ;;  %v638_v17 = vsel %vm636_vm5, %v633_v12, %v635_v14  ;;  %v762_v18 = vpop.permute.xlu1 %761 }
  0xa1   : > { %1533 = vmatmul.mubr.msk.bf16.vlgmr.msra.gmra.mxu0 %vm238_vm2, %v1531_v11  ;;  %1536 = vmatprep.subr.msk.bf16.mxu0 %vm242_vm1, %v638_v17 }
  0xa2   : > { %666 = vmatpush1.bf16.msra.mxu0 %v643_v15  ;;  %1599 = vmatpush3.bf16.msra.mxu1 %v649_v16 }
  0xa3   : > { %683 = vmatprep.mubr.bf16.mxu0 %v1794_v5  ;;  %v764_v20 = vpop.permute.xlu0 %763  ;;  %1604 = vmatprep.subr.bf16.mxu1 %v1793_v3 }
  0xa4   : > { %v768_v21 = vsel %vm767_vm6, %v762_v18, %v764_v20  ;;  %v766_v22 = vpop.permute.xlu1 %765 }
  0xa5   : > { %v769_v23 = vsel %vm767_vm6, %v764_v20, %v766_v22  ;;  %v780_v24 = vsel %vm242_vm1, %v766_v22, 0  ;;  %v774_v25 = vsel %vm242_vm1, %v768_v21, 0 }
  0xa6   : > { %1601 = vmatmul.mubr.msk.bf16.vlgmr.msra.gmra.mxu1 %vm238_vm2, %v1535_v19  ;;  %1540 = vmatprep.subr.msk.bf16.mxu0 %vm242_vm1, %v769_v23 }
  0xa7   : > { %v893_v26 = vpop.permute.xlu0 %892  ;;  %1605 = vmatpush3.bf16.msra.mxu1 %v780_v24  ;;  %1606 = vmatprep.mubr.msk.bf16.mxu1 %vm1795_vm0, %v1793_v3 }
  0xa8   : > { %1610 = vmatprep.subr.bf16.mxu1 %v1793_v3  ;;  %v895_v27 = vpop.permute.xlu1 %894 }
  0xa9   : > { %1537 = vmatmul.mubr.msk.bf16.vlgmr.msra.gmra.mxu0 %vm238_vm2, %v1535_v19  ;;  %v899_v31 = vsel %vm898_vm7, %v893_v26, %v895_v27 }
  0xaa   : > { %797 = vmatpush1.bf16.msra.mxu0 %v774_v25  ;;  %814 = vmatprep.mubr.bf16.mxu0 %v1794_v5  ;;  %v905_v34 = vsel %vm242_vm1, %v899_v31, 0 }
  0xab   : > { %v897_v29 = vpop.permute.xlu0 %896 }
  0xac   : > { %v911_v30 = vsel %vm242_vm1, %v897_v29, 0  ;;  %v900_v32 = vsel %vm898_vm7, %v895_v27, %v897_v29  ;;  %v1024_v33 = vpop.permute.xlu1 %1023 }
  0xad   : > { %1544 = vmatprep.subr.msk.bf16.mxu0 %vm242_vm1, %v900_v32 }
  0xae   : > { %1607 = vmatmul.mubr.msk.bf16.vlgmr.msra.gmra.mxu1 %vm238_vm2, %v1539_v28 }
  0xaf   : > { %1611 = vmatpush3.bf16.msra.mxu1 %v911_v30  ;;  %v1026_v35 = vpop.permute.xlu0 %1025  ;;  %1612 = vmatprep.mubr.msk.bf16.mxu1 %vm1795_vm0, %v1793_v3 }
  0xb0   : > { %1616 = vmatprep.subr.bf16.mxu1 %v1793_v3  ;;  %v1028_v36 = vpop.permute.xlu1 %1027  ;;  %v1030_v40 = vsel %vm1029_vm8, %v1024_v33, %v1026_v35 }
  0xb1   : > { %1541 = vmatmul.mubr.msk.bf16.vlgmr.msra.gmra.mxu0 %vm238_vm2, %v1539_v28  ;;  %v1031_v37 = vsel %vm1029_vm8, %v1026_v35, %v1028_v36  ;;  %v1042_v41 = vsel %vm242_vm1, %v1028_v36, 0  ;;  %v1036_v43 = vsel %vm242_vm1, %v1030_v40, 0 }
  0xb2   : > { %928 = vmatpush1.bf16.msra.mxu0 %v905_v34  ;;  %945 = vmatprep.mubr.bf16.mxu0 %v1794_v5 }
  0xb3   : > { %1548 = vmatprep.subr.msk.bf16.mxu0 %vm242_vm1, %v1031_v37  ;;  %v1155_v39 = vpop.permute.xlu0 %1154 }
  0xb4   : > { %v1157_v42 = vpop.permute.xlu1 %1156 }
  0xb5   : > { %v1161_v49 = vsel %vm1160_vm9, %v1155_v39, %v1157_v42 }
  0xb6   : > { %1613 = vmatmul.mubr.msk.bf16.vlgmr.msra.gmra.mxu1 %vm238_vm2, %v1543_v38  ;;  %v1167_v52 = vsel %vm242_vm1, %v1161_v49, 0 }
  0xb7   : > { %1617 = vmatpush3.bf16.msra.mxu1 %v1042_v41  ;;  %v1159_v44 = vpop.permute.xlu0 %1158  ;;  %1618 = vmatprep.mubr.msk.bf16.mxu1 %vm1795_vm0, %v1793_v3 }
  0xb8   : > { %v1162_v45 = vsel %vm1160_vm9, %v1157_v42, %v1159_v44  ;;  %1622 = vmatprep.subr.bf16.mxu1 %v1793_v3  ;;  %v1286_v46 = vpop.permute.xlu1 %1285  ;;  %v1173_v48 = vsel %vm242_vm1, %v1159_v44, 0 }
  0xb9   : > { %1545 = vmatmul.mubr.msk.bf16.vlgmr.msra.gmra.mxu0 %vm238_vm2, %v1543_v38 }
  0xba   : > { %1059 = vmatpush1.bf16.msra.mxu0 %v1036_v43  ;;  %1076 = vmatprep.mubr.bf16.mxu0 %v1794_v5 }
  0xbb   : > { %1552 = vmatprep.subr.msk.bf16.mxu0 %vm242_vm1, %v1162_v45  ;;  %v1288_v50 = vpop.permute.xlu0 %1287 }
  0xbc   : > { %v1290_v51 = vpop.permute.xlu1 %1289  ;;  %v1292_v54 = vsel %vm1291_vm10, %v1286_v46, %v1288_v50 }
  0xbd   : > { %v1293_v53 = vsel %vm1291_vm10, %v1288_v50, %v1290_v51  ;;  %v1304_v55 = vsel %vm242_vm1, %v1290_v51, 0  ;;  %v1298_v57 = vsel %vm242_vm1, %v1292_v54, 0 }
  0xbe   : > { %1619 = vmatmul.mubr.msk.bf16.vlgmr.msra.gmra.mxu1 %vm238_vm2, %v1547_v47 }
  0xbf   : > { %1623 = vmatpush3.bf16.msra.mxu1 %v1173_v48  ;;  %1624 = vmatprep.mubr.msk.bf16.mxu1 %vm1795_vm0, %v1793_v3 }
  0xc0   : > { %1628 = vmatprep.subr.bf16.mxu1 %v1793_v3 }
  0xc1   : > { %1549 = vmatmul.mubr.msk.bf16.vlgmr.msra.gmra.mxu0 %vm238_vm2, %v1547_v47 }
  0xc2   : > { %1190 = vmatpush1.bf16.msra.mxu0 %v1167_v52  ;;  %1207 = vmatprep.mubr.bf16.mxu0 %v1794_v5 }
  0xc3   : > { %1556 = vmatprep.subr.msk.bf16.mxu0 %vm242_vm1, %v1293_v53 }
  0xc6   : > { %1625 = vmatmul.mubr.msk.bf16.vlgmr.msra.gmra.mxu1 %vm238_vm2, %v1551_v56 }
  0xc7   : > { %1629 = vmatpush3.bf16.msra.mxu1 %v1304_v55  ;;  %1630 = vmatprep.mubr.msk.bf16.mxu1 %vm1795_vm0, %v1793_v3 }
  0xc8   : > { %v336_v59 = vpop.permute.xlu0 %335 }
  0xc9   : > { %1553 = vmatmul.mubr.msk.bf16.vlgmr.msra.gmra.mxu0 %vm238_vm2, %v1551_v56 }
  0xca   : > { %1321 = vmatpush1.bf16.msra.mxu0 %v1298_v57  ;;  %1338 = vmatprep.mubr.bf16.mxu0 %v1794_v5 }
  0xce   : > { %1631 = vmatmul.mubr.msk.bf16.vlgmr.msra.gmra.mxu1 %vm238_vm2, %v1555_v58 }
  0xd1   : > { %1557 = vmatmul.mubr.msk.bf16.vlgmr.msra.gmra.mxu0 %vm238_vm2, %v1555_v58 }
  0xe4   : > { %v286_v60 = vpop.f32.mrf.mxu0 }
  0xe5   : > { %v327_v61 = vpop.f32.mrf.mxu1  ;;  %v2030_v62 = vadd.f32 %v336_v59, %v286_v60 }
  0xe6   : > { %v288_v3 = vpop.f32.mrf.mxu0  ;;  %v340_v63 = vadd.f32 %v336_v59, %v327_v61 }
  0xe7   : > { %v1584_v0 = vpop.f32.mrf.mxu1  ;;  %v2032_v1 = vadd.f32 %v336_v59, %v288_v3 }
  0xe8   : > { %v290_v5 = vpop.f32.mrf.mxu0  ;;  %344 = vst.msk [vmem:[#allocation2 + $0x10] sm:$0xff] %vm343_vm11, %v340_v63 }
  0xe9   : > { %v330_v2 = vpop.f32.mrf.mxu1 }
  0xea   : > { %v291_v4 = vpop.f32.mrf.mxu0 }
  0xeb   : > { %v1585_v6 = vpop.f32.mrf.mxu1 }
  0xef   : > { %v347_v7 = vld [vmem:[#allocation2 + $0x10] sm:$0xff] }
 0x155   : > { %v464_v8 = vpop.f32.mrf.mxu1 }
 0x156   : > { %v472_v9 = vadd.f32 %v464_v8, %v347_v7 }
 0x157   : > { %v1590_v10 = vpop.f32.mrf.mxu1 }
 0x158   : > { %475 = vst.msk [vmem:[#allocation2 + $0x10] sm:$0xff] %vm343_vm11, %v472_v9 }
 0x159   : > { %v423_v11 = vpop.f32.mrf.mxu0  ;;  %v467_v12 = vpop.f32.mrf.mxu1 }
 0x15a   : > { %v470_v3 = vadd.f32 %v423_v11, %v2030_v62 }
 0x15b   : > { %v425_v13 = vpop.f32.mrf.mxu0  ;;  %v1591_v14 = vpop.f32.mrf.mxu1 }
 0x15c   : > { %v471_v5 = vadd.f32 %v425_v13, %v2032_v1 }
 0x15d   : > { %v427_v15 = vpop.f32.mrf.mxu0 }
 0x15e   : > { %v595_v16 = vpop.f32.mrf.mxu1 }
 0x15f   : > { %v428_v17 = vpop.f32.mrf.mxu0  ;;  %v478_v18 = vld [vmem:[#allocation2 + $0x10] sm:$0xff] }
 0x160   : > { %v1596_v19 = vpop.f32.mrf.mxu1  ;;  %v603_v21 = vadd.f32 %v595_v16, %v478_v18 }
 0x161   : > { %v554_v20 = vpop.f32.mrf.mxu0 }
 0x162   : > { %v598_v22 = vpop.f32.mrf.mxu1  ;;  %606 = vst.msk [vmem:[#allocation2 + $0x10] sm:$0xff] %vm343_vm11, %v603_v21  ;;  %v601_v2 = vadd.f32 %v554_v20, %v470_v3 }
 0x163   : > { %v556_v23 = vpop.f32.mrf.mxu0 }
 0x164   : > { %v1597_v24 = vpop.f32.mrf.mxu1  ;;  %v602_v7 = vadd.f32 %v556_v23, %v471_v5 }
 0x165   : > { %v558_v25 = vpop.f32.mrf.mxu0 }
 0x166   : > { %v726_v26 = vpop.f32.mrf.mxu1 }
 0x167   : > { %v559_v27 = vpop.f32.mrf.mxu0 }
 0x168   : > { %v1602_v28 = vpop.f32.mrf.mxu1 }
 0x169   : > { %v685_v29 = vpop.f32.mrf.mxu0  ;;  %v609_v30 = vld [vmem:[#allocation2 + $0x10] sm:$0xff] }
 0x16a   : > { %v729_v31 = vpop.f32.mrf.mxu1  ;;  %v734_v33 = vadd.f32 %v726_v26, %v609_v30  ;;  %v732_v8 = vadd.f32 %v685_v29, %v601_v2 }
 0x16b   : > { %v687_v32 = vpop.f32.mrf.mxu0 }
 0x16c   : > { %v1603_v34 = vpop.f32.mrf.mxu1  ;;  %737 = vst.msk [vmem:[#allocation2 + $0x10] sm:$0xff] %vm343_vm11, %v734_v33  ;;  %v733_v15 = vadd.f32 %v687_v32, %v602_v7 }
 0x16d   : > { %v689_v35 = vpop.f32.mrf.mxu0 }
 0x16e   : > { %v857_v36 = vpop.f32.mrf.mxu1 }
 0x16f   : > { %v690_v37 = vpop.f32.mrf.mxu0 }
 0x170   : > { %v1608_v38 = vpop.f32.mrf.mxu1 }
 0x171   : > { %v816_v39 = vpop.f32.mrf.mxu0 }
 0x172   : > { %v860_v40 = vpop.f32.mrf.mxu1  ;;  %v863_v16 = vadd.f32 %v816_v39, %v732_v8 }
 0x173   : > { %v818_v41 = vpop.f32.mrf.mxu0  ;;  %v740_v42 = vld [vmem:[#allocation2 + $0x10] sm:$0xff] }
 0x174   : > { %v1609_v43 = vpop.f32.mrf.mxu1  ;;  %v865_v44 = vadd.f32 %v857_v36, %v740_v42  ;;  %v864_v11 = vadd.f32 %v818_v41, %v733_v15 }
 0x175   : > { %v820_v45 = vpop.f32.mrf.mxu0 }
 0x176   : > { %v988_v46 = vpop.f32.mrf.mxu1  ;;  %868 = vst.msk [vmem:[#allocation2 + $0x10] sm:$0xff] %vm343_vm11, %v865_v44 }
 0x177   : > { %v821_v47 = vpop.f32.mrf.mxu0 }
 0x178   : > { %v1614_v48 = vpop.f32.mrf.mxu1 }
 0x179   : > { %v947_v49 = vpop.f32.mrf.mxu0 }
 0x17a   : > { %v991_v50 = vpop.f32.mrf.mxu1  ;;  %v994_v18 = vadd.f32 %v947_v49, %v863_v16 }
 0x17b   : > { %v949_v51 = vpop.f32.mrf.mxu0 }
 0x17c   : > { %v1615_v52 = vpop.f32.mrf.mxu1  ;;  %v995_v19 = vadd.f32 %v949_v51, %v864_v11 }
 0x17d   : > { %v951_v53 = vpop.f32.mrf.mxu0  ;;  %v871_v54 = vld [vmem:[#allocation2 + $0x10] sm:$0xff] }
 0x17e   : > { %v1119_v55 = vpop.f32.mrf.mxu1  ;;  %v996_v56 = vadd.f32 %v988_v46, %v871_v54 }
 0x17f   : > { %v952_v57 = vpop.f32.mrf.mxu0 }
 0x180   : > { %v1620_v58 = vpop.f32.mrf.mxu1  ;;  %999 = vst.msk [vmem:[#allocation2 + $0x10] sm:$0xff] %vm343_vm11, %v996_v56 }
 0x181   : > { %v1078_v59 = vpop.f32.mrf.mxu0 }
 0x182   : > { %v1122_v60 = vpop.f32.mrf.mxu1  ;;  %v1125_v20 = vadd.f32 %v1078_v59, %v994_v18 }
 0x183   : > { %v1080_v61 = vpop.f32.mrf.mxu0 }
 0x184   : > { %v1621_v63 = vpop.f32.mrf.mxu1  ;;  %v1126_v23 = vadd.f32 %v1080_v61, %v995_v19 }
 0x185   : > { %v1082_v0 = vpop.f32.mrf.mxu0 }
 0x186   : > { %v1250_v4 = vpop.f32.mrf.mxu1 }
 0x187   : > { %v1083_v6 = vpop.f32.mrf.mxu0  ;;  %v1002_v9 = vld [vmem:[#allocation2 + $0x10] sm:$0xff] }
 0x188   : > { %v1626_v10 = vpop.f32.mrf.mxu1  ;;  %v1127_v12 = vadd.f32 %v1119_v55, %v1002_v9 }
 0x189   : > { %v1209_v14 = vpop.f32.mrf.mxu0 }
 0x18a   : > { %v1253_v17 = vpop.f32.mrf.mxu1  ;;  %1130 = vst.msk [vmem:[#allocation2 + $0x10] sm:$0xff] %vm343_vm11, %v1127_v12  ;;  %v1256_v24 = vadd.f32 %v1209_v14, %v1125_v20 }
 0x18b   : > { %v1211_v62 = vpop.f32.mrf.mxu0 }
 0x18c   : > { %v1627_v1 = vpop.f32.mrf.mxu1  ;;  %v1257_v27 = vadd.f32 %v1211_v62, %v1126_v23 }
 0x18d   : > { %v1213_v13 = vpop.f32.mrf.mxu0 }
 0x18e   : > { %v1381_v21 = vpop.f32.mrf.mxu1 }
 0x18f   : > { %v1214_v22 = vpop.f32.mrf.mxu0 }
 0x190   : > { %v1632_v25 = vpop.f32.mrf.mxu1 }
 0x191   : > { %v1340_v26 = vpop.f32.mrf.mxu0  ;;  %v1133_v28 = vld [vmem:[#allocation2 + $0x10] sm:$0xff] }
 0x192   : > { %v1387_v29 = vadd.f32 %v1340_v26, %v1256_v24  ;;  %v1384_v30 = vpop.f32.mrf.mxu1  ;;  %v1258_v31 = vadd.f32 %v1250_v4, %v1133_v28 }
 0x193   : > { %v1342_v32 = vpop.f32.mrf.mxu0 }
 0x194   : > { %v1388_v33 = vadd.f32 %v1342_v32, %v1257_v27  ;;  %v1633_v34 = vpop.f32.mrf.mxu1  ;;  %1396 = vst [vmem:[%s203_s27] sm:$0xff] %v1387_v29  ;;  %1261 = vst.msk [vmem:[#allocation2 + $0x10] sm:$0xff] %vm343_vm11, %v1258_v31 }
 0x195   : > { %v1344_v35 = vpop.f32.mrf.mxu0 }
 0x196   : > { %1397 = vst [vmem:[%s203_s27 + $0x8] sm:$0xff] %v1388_v33 }
 0x197   : > { %v1345_v36 = vpop.f32.mrf.mxu0 }
 0x19b   : > { %v1264_v37 = vld [vmem:[#allocation2 + $0x10] sm:$0xff] }
 0x19c   : > { %v1389_v38 = vadd.f32 %v1381_v21, %v1264_v37 }
 0x19e   : > { %1392 = vst.msk [vmem:[#allocation2 + $0x10] sm:$0xff] %vm343_vm11, %v1389_v38 }
 0x1a5   : > { %v1395_v39 = vld [vmem:[#allocation2 + $0x10] sm:$0xff] }
 0x1a6   : > { %1398 = vst.msk [vmem:[%s203_s27 + $0x10] sm:$0xff] %vm343_vm11, %v1395_v39 }
 0x1a7   : > { %1727 = shalt.err (!%p1724_p5)
}
 0x1a8   : > { %s1728_s10 = scalar_lea.hbm %s2052_s5, 384  ;;  %s1732_s19 = scalar_lea.hbm %s2098_s3, 768 }
 0x1a9   : > { %p1729_p6 = scmp.ne.s32.totalorder %s2052_s5, %s1728_s10  ;;  %p1733_p10 = scmp.lt.s32.totalorder %s2052_s5, %s2098_s3 }
 0x1aa   : > { %p1734_p11 = scmp.lt.s32.totalorder %s1732_s19, %s1728_s10 }
 0x1ab   : > { %p1730_p7 = pnand %p1729_p6, %p1865_p4 }
 0x1ac   : > { %p1735_p12 = por %p1734_p11, %p1733_p10 }
 0x1ad   : > { %p1731_p9 = pneg %p1730_p7 }
 0x1af   : > { %p1736_p13 = pnand %p1735_p12, %p1731_p9 }
 0x1b1   : > { %1739 = shalt.err (!%p1736_p13)
}
 0x1b2   : > { %1637 = dma.vmem_to_hbm [thread:$0]  (%p1865_p4), %s1417_s29, 384, %s2052_s5, %s1400_s6  }
 0x1b3 PF: > { %p1643_p0 = scmp.ge.s32.totalorder %s1790_s17, 2  ;;  %s1428_s26 = sand.u32 1, %s1770_s12  }
 0x1b4   : > { %s1429_s27 = scalar_lea.sflag [#allocation4], %s1428_s26 }
 0x1b5   : > { %p1640_p1 = pnand %p1643_p0, %p1872_p8 }
 0x1b7   : > { %p1641_p2 = pneg %p1640_p1 }
 0x1b9   : > { %1765 = dma.done.wait (%p1641_p2), %s1429_s27, 384  }
 0x1ba   : > { %1767 = vsyncadd (%p1641_p2), %s1429_s27, 4294966912  ;;  %s16_s17 = sadd.s32 1, %s1790_s17   ;;  %s2101_s12 = smov %s1774_s13 }
 0x1bb   : > { %p13_p3 = scmp.ge.s32.totalorder %s16_s17, 4   ;;  %s2102_s13 = smov %s1778_s14 }
 0x1bc   : > { %s2103_s14 = smov %s1878_s25  ;;  %s2104_s15 = smov %s1786_s16 }
 0x1bd   : > { %s2105_s16 = smov %s2107_s20  ;;  %15 = sbr.rel (!%p13_p3) target bundleno = 4 (0x4), region = 81 }
 0x1c2   :  { %1434 = vsyncpa [#allocation4], 1 }
 0x1c3   :  { %1436 = vsyncpa [#allocation4 + $0x1], 1 }

</bundles_post_ra>
